<compile_context>
chip_gen: v5e
topology: v5e:2x2
jax: 0.10.0
libtpu: 0.0.40
codegen_flags: <defaults>
</compile_context>

<pallas_src>
import math

import jax
import jax.numpy as jnp
from jax import lax
from jax.experimental import pallas as pl
from jax.experimental.pallas import tpu as pltpu


def _round_up(x, m):
    return ((x + m - 1) // m) * m


def _linear_logsoftmax_kernel(x_ref, w_ref, b_ref, o_ref):
    # x_ref: (tb, D), w_ref: (Cp, D), b_ref: (1, Cp), o_ref: (tb, Cp)
    x = x_ref[...]
    w = w_ref[...]
    b = b_ref[...]

    # fc: x @ W^T + b, contracting on the last dim of both operands.
    logits = lax.dot_general(
        x, w,
        dimension_numbers=(((1,), (1,)), ((), ())),
        preferred_element_type=jnp.float32,
    ) + b

    # Numerically-stable log-softmax over the class axis (dim=1).
    m = jnp.max(logits, axis=-1, keepdims=True)
    z = logits - m
    lse = jnp.log(jnp.sum(jnp.exp(z), axis=-1, keepdims=True))
    o_ref[...] = (z - lse).astype(o_ref.dtype)


def linear_logsoftmax(x, weight, bias, *, tile_batch=256):
    B, D = x.shape
    C, D2 = weight.shape
    assert D == D2, "weight must be (nclass, input_dim)"
    f32 = 4

    # --- lane-dense class axis: pad C up to a multiple of 128 -------------
    C_pad = _round_up(C, 128)
    if C_pad != C:
        weight = jnp.pad(weight, ((0, C_pad - C), (0, 0)))
        bias = jnp.concatenate(
            [bias.reshape(-1),
             jnp.full((C_pad - C,), -1e30, dtype=bias.dtype)])
    bias2d = bias.reshape(1, C_pad)

    # --- sublane-aligned batch axis: pad B up to a multiple of 8 ----------
    B_pad = _round_up(B, 8)
    if B_pad != B:
        x = jnp.pad(x, ((0, B_pad - B), (0, 0)))

    # Batch tile: big enough to fill the MXU / amortize per-step overhead.
    tb = min(tile_batch, B_pad)
    grid = (pl.cdiv(B_pad, tb),)

    # VMEM budget: double-buffered x/out tiles + resident weight/bias.
    vmem_bytes = (2 * tb * D + 2 * tb * C_pad
                  + 2 * C_pad * D + 2 * C_pad) * f32
    vmem_limit = int(min(64 << 20, max(32 << 20, vmem_bytes * 2)))

    cost = pl.CostEstimate(
        flops=2 * B_pad * D * C_pad,
        transcendentals=B_pad * C_pad,              # exp per output element
        bytes_accessed=(B_pad * D + C_pad * D + C_pad + B_pad * C_pad) * f32,
    )

    out = pl.pallas_call(
        _linear_logsoftmax_kernel,
        out_shape=jax.ShapeDtypeStruct((B_pad, C_pad), x.dtype),
        grid_spec=pltpu.PrefetchScalarGridSpec(
            num_scalar_prefetch=0,
            grid=grid,
            in_specs=[
                pl.BlockSpec((tb, D), lambda i: (i, 0)),       # x batch tile
                pl.BlockSpec((C_pad, D), lambda i: (0, 0)),    # full padded W
                pl.BlockSpec((1, C_pad), lambda i: (0, 0)),    # bias row
            ],
            out_specs=pl.BlockSpec((tb, C_pad), lambda i: (i, 0)),
        ),
        compiler_params=pltpu.CompilerParams(
            dimension_semantics=("parallel",),   # batch tiles are independent
            vmem_limit_bytes=vmem_limit,
        ),
        cost_estimate=cost,
    )(x, weight, bias2d)

    # Drop batch / class padding.
    return out[:B, :C]


def reference(x, weight, bias):
    logits = x @ weight.T + bias.reshape(1, -1)
    return jax.nn.log_softmax(logits, axis=1)


if __name__ == "__main__":
    key = jax.random.PRNGKey(0)
    k_x, k_w, k_b = jax.random.split(key, 3)

    batch, input_dim, nclass = 16, 32, 16

    # deterministic "nn.Linear"-style init: U(-1/sqrt(in), 1/sqrt(in))
    bound = 1.0 / math.sqrt(input_dim)
    weight = jax.random.uniform(
        k_w, (nclass, input_dim), jnp.float32, minval=-bound, maxval=bound)
    bias = jax.random.uniform(
        k_b, (nclass,), jnp.float32, minval=-bound, maxval=bound)

    x = jax.random.normal(k_x, (batch, input_dim), jnp.float32)

    out = linear_logsoftmax(x, weight, bias)
    out = jax.block_until_ready(out)

    ref = reference(x, weight, bias)
    assert out.shape == (batch, nclass)
    assert jnp.allclose(out, ref, atol=1e-5, rtol=1e-5), "mismatch vs reference"

    print("KERNEL_OK")
</pallas_src>

<mosaic_0001>
module attributes {stable_mosaic.version = 11 : i64} {
  func.func @_linear_logsoftmax_kernel(%arg0: i32, %arg1: memref<16x32xf32, #tpu.memory_space<vmem>>, %arg2: memref<128x32xf32, #tpu.memory_space<vmem>>, %arg3: memref<1x128xf32, #tpu.memory_space<vmem>>, %arg4: memref<16x128xf32, #tpu.memory_space<vmem>>) attributes {dimension_semantics = [#tpu.dimension_semantics<parallel>], iteration_bounds = array<i64: 1>, scalar_prefetch = 0 : i64, scratch_operands = 0 : i64, tpu.core_type = #tpu.core_type<tc>, window_params = [{transform_indices = @transform_0, window_bounds = array<i64: 16, 32>}, {pipeline_mode = #tpu.pipeline_mode<synchronous>, transform_indices = @transform_1, window_bounds = array<i64: 128, 32>}, {pipeline_mode = #tpu.pipeline_mode<synchronous>, transform_indices = @transform_2, window_bounds = array<i64: 1, 128>}, {transform_indices = @transform_3, window_bounds = array<i64: 16, 128>}]} {
    %c0 = arith.constant 0 : index
    %c0_0 = arith.constant 0 : index
    %0 = vector.load %arg1[%c0, %c0_0] : memref<16x32xf32, #tpu.memory_space<vmem>>, vector<16x32xf32>
    %c0_1 = arith.constant 0 : index
    %c0_2 = arith.constant 0 : index
    %1 = vector.load %arg2[%c0_1, %c0_2] : memref<128x32xf32, #tpu.memory_space<vmem>>, vector<128x32xf32>
    %c0_3 = arith.constant 0 : index
    %c0_4 = arith.constant 0 : index
    %2 = vector.load %arg3[%c0_3, %c0_4] : memref<1x128xf32, #tpu.memory_space<vmem>>, vector<1x128xf32>
    %cst = arith.constant dense<0.000000e+00> : vector<16x128xf32>
    %3 = tpu.matmul %0, %1, %cst {dimension_numbers = #tpu.dot_dimension_numbers<[1], [1], [0], [0], [0, 0, 1, 0], [], []>} : vector<16x32xf32>, vector<128x32xf32>, vector<16x128xf32> -> vector<16x128xf32>
    %4 = vector.broadcast %2 : vector<1x128xf32> to vector<16x128xf32>
    %5 = arith.addf %3, %4 : vector<16x128xf32>
    %cst_5 = arith.constant dense<0xFF800000> : vector<16xf32>
    %6 = vector.multi_reduction <maximumf>, %5, %cst_5 [1] : vector<16x128xf32> to vector<16xf32>
    %7 = vector.shape_cast %6 : vector<16xf32> to vector<16x1xf32>
    %8 = vector.broadcast %7 : vector<16x1xf32> to vector<16x128xf32>
    %9 = arith.subf %5, %8 : vector<16x128xf32>
    %10 = math.exp %9 : vector<16x128xf32>
    %cst_6 = arith.constant dense<0.000000e+00> : vector<16xf32>
    %11 = vector.multi_reduction <add>, %10, %cst_6 [1] : vector<16x128xf32> to vector<16xf32>
    %12 = vector.shape_cast %11 : vector<16xf32> to vector<16x1xf32>
    %13 = math.log %12 : vector<16x1xf32>
    %14 = vector.broadcast %13 : vector<16x1xf32> to vector<16x128xf32>
    %15 = arith.subf %9, %14 : vector<16x128xf32>
    %c0_7 = arith.constant 0 : index
    %c0_8 = arith.constant 0 : index
    %16 = vector.load %arg4[%c0_7, %c0_8] : memref<16x128xf32, #tpu.memory_space<vmem>>, vector<16x128xf32>
    tpu.vector_store %arg4[%c0_7, %c0_8], %15 {strides = array<i32>} : memref<16x128xf32, #tpu.memory_space<vmem>>, vector<16x128xf32>,
    return
  }
  func.func @transform_0(%arg0: i32) -> (i32, i32) {
    %c0_i32 = arith.constant 0 : i32
    %c0_i32_0 = arith.constant 0 : i32
    return %arg0, %c0_i32 : i32, i32
  }
  func.func @transform_1(%arg0: i32) -> (i32, i32) {
    %c0_i32 = arith.constant 0 : i32
    %c0_i32_0 = arith.constant 0 : i32
    %c0_i32_1 = arith.constant 0 : i32
    return %c0_i32, %c0_i32_0 : i32, i32
  }
  func.func @transform_2(%arg0: i32) -> (i32, i32) {
    %c0_i32 = arith.constant 0 : i32
    %c0_i32_0 = arith.constant 0 : i32
    %c0_i32_1 = arith.constant 0 : i32
    return %c0_i32, %c0_i32_0 : i32, i32
  }
  func.func @transform_3(%arg0: i32) -> (i32, i32) {
    %c0_i32 = arith.constant 0 : i32
    %c0_i32_0 = arith.constant 0 : i32
    return %arg0, %c0_i32 : i32, i32
  }
}

</mosaic_0001>

<bundles_post_ra>
// kernel: tpu_custom_call.1
= control target key start
LH: loop header
LB: loop body
LE: loop exit
PB: predicated region body
PF: predicated region fallthrough
CT: control target
= control target key end

     0   :  { %vm37_vm0 = vcmask 261120   ;;  %s344_s0 = inlined_call_operand.vmem [shape: f32[16,32], index: 0, kind: input, shape index: {}]   ;;  %s345_s1 = inlined_call_operand.vmem [shape: f32[128,32], index: 1, kind: input, shape index: {}]   ;;  %s346_s2 = inlined_call_operand.vmem [shape: f32[1,128], index: 2, kind: input, shape index: {}]   ;;  %s347_s3 = inlined_call_operand.hbm [shape: f32[16,128], index: 3, kind: output, shape index: {}]  }
   0x1   :  { %v32_v0 = vld [vmem:[%s345_s1 + $0x78] sm:$0xff]  ;;  %v31_v1 = vld [vmem:[%s345_s1 + $0x70] sm:$0xff] }
   0x2   :  { %155 = vmatpush.xpose.msk.msra.mxu0 %vm37_vm0, %v32_v0  ;;  %173 = vmatpush.xpose.msk.msra.mxu1 %vm37_vm0, %v32_v0 }
   0x3   :  { %8 = vsyncpa [#allocation3], 0  ;;  %v30_v2 = vld [vmem:[%s345_s1 + $0x68] sm:$0xff]  ;;  %v29_v3 = vld [vmem:[%s345_s1 + $0x60] sm:$0xff]  ;;  %s143_s24 = sshll.u32 %s347_s3, 4  ;;  %s228_s25 = smov 128   ;;  %s144_s24 = int_to_ptr.hbm [resolvable:$true] %s143_s24 }
   0x4   :  { %v28_v4 = vld [vmem:[%s345_s1 + $0x58] sm:$0xff]  ;;  %v27_v5 = vld [vmem:[%s345_s1 + $0x50] sm:$0xff]  ;;  %v26_v6 = vld [vmem:[%s345_s1 + $0x48] sm:$0xff]  ;;  %s229_s26 = smov 8  }
   0x5   :  { %v25_v7 = vld [vmem:[%s345_s1 + $0x40] sm:$0xff]  ;;  %v24_v8 = vld [vmem:[%s345_s1 + $0x38] sm:$0xff]  ;;  %v23_v9 = vld [vmem:[%s345_s1 + $0x30] sm:$0xff] }
   0x6   :  { %156 = vmatpush.xpose.msk.msra.mxu0 %vm37_vm0, %v31_v1  ;;  %174 = vmatpush.xpose.msk.msra.mxu1 %vm37_vm0, %v31_v1  ;;  %v22_v10 = vld [vmem:[%s345_s1 + $0x28] sm:$0xff]  ;;  %v21_v11 = vld [vmem:[%s345_s1 + $0x20] sm:$0xff]  ;;  %v20_v12 = vld [vmem:[%s345_s1 + $0x18] sm:$0xff] }
   0x7   :  { %v19_v13 = vld [vmem:[%s345_s1 + $0x10] sm:$0xff]  ;;  %v18_v14 = vld [vmem:[%s345_s1 + $0x8] sm:$0xff]  ;;  %v17_v15 = vld [vmem:[%s345_s1] sm:$0xff] }
   0x8   :  { %v15_v16 = vld [vmem:[%s344_s0] sm:$0xff]  ;;  %v16_v17 = vld [vmem:[%s344_s0 + $0x8] sm:$0xff]  ;;  %s227_s0 = smov [#allocation2]  }
   0x9   :  { %v192_v18 = vld [vmem:[%s346_s2] ss:$0 sm:$0xff]  ;;  %s141_s1 = sshll.u32 %s227_s0, 4  ;;  %s142_s1 = int_to_ptr.vmem [resolvable:$true] %s141_s1 }
   0xa   :  { %157 = vmatpush.xpose.msk.msra.mxu0 %vm37_vm0, %v30_v2  ;;  %175 = vmatpush.xpose.msk.msra.mxu1 %vm37_vm0, %v30_v2 }
   0xe   :  { %158 = vmatpush.xpose.msk.msra.mxu0 %vm37_vm0, %v29_v3  ;;  %176 = vmatpush.xpose.msk.msra.mxu1 %vm37_vm0, %v29_v3 }
  0x12   :  { %159 = vmatpush.xpose.msk.msra.mxu0 %vm37_vm0, %v28_v4  ;;  %177 = vmatpush.xpose.msk.msra.mxu1 %vm37_vm0, %v28_v4 }
  0x16   :  { %160 = vmatpush.xpose.msk.msra.mxu0 %vm37_vm0, %v27_v5  ;;  %178 = vmatpush.xpose.msk.msra.mxu1 %vm37_vm0, %v27_v5 }
  0x1a   :  { %161 = vmatpush.xpose.msk.msra.mxu0 %vm37_vm0, %v26_v6  ;;  %179 = vmatpush.xpose.msk.msra.mxu1 %vm37_vm0, %v26_v6 }
  0x1e   :  { %162 = vmatpush.xpose.msk.msra.mxu0 %vm37_vm0, %v25_v7  ;;  %180 = vmatpush.xpose.msk.msra.mxu1 %vm37_vm0, %v25_v7 }
  0x22   :  { %163 = vmatpush.xpose.msk.msra.mxu0 %vm37_vm0, %v24_v8  ;;  %181 = vmatpush.xpose.msk.msra.mxu1 %vm37_vm0, %v24_v8 }
  0x26   :  { %164 = vmatpush.xpose.msk.msra.mxu0 %vm37_vm0, %v23_v9  ;;  %182 = vmatpush.xpose.msk.msra.mxu1 %vm37_vm0, %v23_v9 }
  0x2a   :  { %165 = vmatpush.xpose.msk.msra.mxu0 %vm37_vm0, %v22_v10  ;;  %183 = vmatpush.xpose.msk.msra.mxu1 %vm37_vm0, %v22_v10 }
  0x2e   :  { %166 = vmatpush.xpose.msk.msra.mxu0 %vm37_vm0, %v21_v11  ;;  %184 = vmatpush.xpose.msk.msra.mxu1 %vm37_vm0, %v21_v11 }
  0x32   :  { %167 = vmatpush.xpose.msk.msra.mxu0 %vm37_vm0, %v20_v12  ;;  %185 = vmatpush.xpose.msk.msra.mxu1 %vm37_vm0, %v20_v12 }
  0x36   :  { %168 = vmatpush.xpose.msk.msra.mxu0 %vm37_vm0, %v19_v13  ;;  %186 = vmatpush.xpose.msk.msra.mxu1 %vm37_vm0, %v19_v13 }
  0x3a   :  { %169 = vmatpush.xpose.msk.msra.mxu0 %vm37_vm0, %v18_v14  ;;  %187 = vmatpush.xpose.msk.msra.mxu1 %vm37_vm0, %v18_v14 }
  0x3e   :  { %170 = vmatpush.xpose.msk.msra.mxu0 %vm37_vm0, %v17_v15  ;;  %188 = vmatpush.xpose.msk.msra.mxu1 %vm37_vm0, %v17_v15 }
  0x41   :  { %171 = vmatmul.msk.f32.vlgmr.msra.gmra.mxu0 %vm37_vm0, %v15_v16  ;;  %172 = vmatmul.msk.f32.vlgmr.msra.gmra.mxu1 %vm37_vm0, %v16_v17 }
  0xbe   :  { %v109_v19 = vpop.f32.mrf.mxu0  ;;  %v112_v21 = vpop.f32.mrf.mxu1 }
  0xbf   :  { %v110_v20 = vadd.f32 %v192_v18, %v109_v19  ;;  %v113_v22 = vadd.f32 %v192_v18, %v112_v21 }
  0xc1   :  { %115 = vmax.xlane.f32.xlu0 %v110_v20 }
  0xc9   :  { %117 = vmax.xlane.f32.xlu0 %v113_v22 }
 0x134   :  { %v116_v23 = vpop.xlane.xlu0 %115 }
 0x135   :  { %v119_v24 = vsub.f32 %v110_v20, %v116_v23 }
 0x137   :  { %v121_v25 = vmul.f32 1.442695, %v119_v24 }
 0x139   :  { %193 = vpow2.f32 %v121_v25 }
 0x13c   :  { %v118_v26 = vpop.xlane.xlu0 %117 }
 0x13d   :  { %v120_v27 = vsub.f32 %v113_v22, %v118_v26 }
 0x13f   :  { %v194_v28 = vpop.eup %193  ;;  %v123_v29 = vmul.f32 1.442695, %v120_v27 }
 0x140   :  { %125 = vadd.xlane.f32.xlu1 %v194_v28 }
 0x141   :  { %195 = vpow2.f32 %v123_v29 }
 0x147   :  { %v196_v30 = vpop.eup %195 }
 0x148   :  { %127 = vadd.xlane.f32.xlu1 %v196_v30 }
 0x1b3   :  { %v126_v31 = vpop.xlane.xlu1 %125 }
 0x1b4   :  { %197 = vlog2.f32 %v126_v31 }
 0x1ba   :  { %v198_v32 = vpop.eup %197 }
 0x1bb   :  { %v130_v33 = vmul.f32 0.6931472, %v198_v32  ;;  %v128_v34 = vpop.xlane.xlu1 %127 }
 0x1bc   :  { %199 = vlog2.f32 %v128_v34 }
 0x1bd   :  { %v133_v35 = vsub.f32 %v119_v24, %v130_v33 }
 0x1bf   :  { %135 = vst [vmem:[#allocation2] sm:$0xff] %v133_v35 }
 0x1c2   :  { %v200_v36 = vpop.eup %199 }
 0x1c3   :  { %v132_v37 = vmul.f32 0.6931472, %v200_v36 }
 0x1c5   :  { %v134_v38 = vsub.f32 %v120_v27, %v132_v37 }
 0x1c7   :  { %136 = vst [vmem:[#allocation2 + $0x8] sm:$0xff] %v134_v38 }
 0x1c8   :  { %149 = dma.vmem_to_hbm [thread:$0]  %s142_s1, 256, %s144_s24, [#allocation3], %s228_s25, %s228_s25, %s229_s26  }
 0x1c9   :  { %225 = dma.done.wait [#allocation3], 256  }
 0x1ca   :  { %226 = vsyncadd [#allocation3], 4294967040 }
 0x1cb   :  { %154 = vsyncpa [#allocation3], 1 }

</bundles_post_ra>
